<compile_context>
chip_gen: v7x
topology: tpu7x:2x2x1
jax: 0.10.0
libtpu: 0.0.40
codegen_flags: <defaults>
</compile_context>

<pallas_src>
import math

import jax
import jax.numpy as jnp
from jax.experimental import pallas as pl
from jax.experimental.pallas import tpu as pltpu


def _round_up(x, m):
    return ((x + m - 1) // m) * m


def _linear_kernel_single_k(x_ref, w_ref, b_ref, o_ref):
    """Whole contraction in one tile: fused matmul + bias, no scratch.

    x_ref : (tm, Cin)   activation tile
    w_ref : (Cin, Cout) weight (transposed, whole)
    b_ref : (1, Cout)   bias
    o_ref : (tm, Cout)  output tile
    """
    o_ref[...] = (
        jnp.dot(x_ref[...], w_ref[...], preferred_element_type=jnp.float32)
        + b_ref[...]
    ).astype(o_ref.dtype)


def _linear_kernel_multi_k(x_ref, w_ref, b_ref, o_ref, acc_ref):
    """Large-Cin path. Grid = (row_tiles, k_tiles); K is the trailing reduction axis.

    x_ref  : (tm, tk)     activation tile
    w_ref  : (tk, Cout)   weight tile (Cin-major)
    b_ref  : (1, Cout)    bias
    o_ref  : (tm, Cout)   output tile (written once, on the last K step)
    acc_ref: (tm, Cout)   f32 VMEM accumulator scratch
    """
    k = pl.program_id(1)

    @pl.when(k == 0)
    def _():
        acc_ref[...] = jnp.zeros_like(acc_ref)

    acc_ref[...] += jnp.dot(
        x_ref[...], w_ref[...], preferred_element_type=jnp.float32
    )

    @pl.when(k == pl.num_programs(1) - 1)
    def _():
        o_ref[...] = (acc_ref[...] + b_ref[...]).astype(o_ref.dtype)


def focal_linear(x, weight, bias, *, tm=256, tk=512, compute_dtype=None):
    """y = x @ weight.T + bias  (PyTorch nn.Linear semantics) via Pallas.

    x      : (..., Cin)
    weight : (Cout, Cin)   (PyTorch Linear layout)
    bias   : (Cout,)
    returns: (..., Cout)
    compute_dtype: optionally cast matmul operands (e.g. jnp.bfloat16) while
                   keeping f32 accumulation.
    """
    *lead, Cin = x.shape
    Cout = weight.shape[0]
    out_dtype = x.dtype

    # Flatten all leading dims into one "rows" axis -> a single big matmul.
    M = 1
    for d in lead:
        M *= int(d)
    x2 = x.reshape(M, Cin)

    if compute_dtype is not None:
        x2 = x2.astype(compute_dtype)
        weight = weight.astype(compute_dtype)

    # Row tile: multiple of 8 sublanes (shrinks for tiny inputs).
    tm = min(tm, _round_up(M, 8))
    M_pad = _round_up(M, tm)

    # Contraction tile: whole Cin if it fits, otherwise 128-aligned chunks.
    single_k = Cin <= tk
    if single_k:
        tk = Cin
        K_pad = Cin
    else:
        tk = _round_up(tk, 128)
        K_pad = _round_up(Cin, tk)

    # Pad only when shapes are not already aligned (avoid extra HBM copies).
    if (M_pad != M) or (K_pad != Cin):
        x2 = jnp.pad(x2, ((0, M_pad - M), (0, K_pad - Cin)))

    wt = weight.T  # (Cin, Cout): MXU-friendly contraction layout (tiny tensor)
    if K_pad != Cin:
        wt = jnp.pad(wt, ((0, K_pad - Cin), (0, 0)))
    b2 = bias.reshape(1, Cout).astype(jnp.float32)

    if single_k:
        grid = (M_pad // tm,)
        out = pl.pallas_call(
            _linear_kernel_single_k,
            out_shape=jax.ShapeDtypeStruct((M_pad, Cout), out_dtype),
            grid_spec=pltpu.PrefetchScalarGridSpec(
                num_scalar_prefetch=0,
                grid=grid,
                in_specs=[
                    pl.BlockSpec((tm, tk), lambda i: (i, 0)),
                    pl.BlockSpec((tk, Cout), lambda i: (0, 0)),
                    pl.BlockSpec((1, Cout), lambda i: (0, 0)),
                ],
                out_specs=pl.BlockSpec((tm, Cout), lambda i: (i, 0)),
            ),
            compiler_params=pltpu.CompilerParams(
                dimension_semantics=("parallel",),
                vmem_limit_bytes=32 * 1024 * 1024,  # safe on v5e/v6e/v7x
            ),
        )(x2, wt, b2)
    else:
        grid = (M_pad // tm, K_pad // tk)
        out = pl.pallas_call(
            _linear_kernel_multi_k,
            out_shape=jax.ShapeDtypeStruct((M_pad, Cout), out_dtype),
            grid_spec=pltpu.PrefetchScalarGridSpec(
                num_scalar_prefetch=0,
                grid=grid,
                in_specs=[
                    pl.BlockSpec((tm, tk), lambda i, k: (i, k)),
                    pl.BlockSpec((tk, Cout), lambda i, k: (k, 0)),
                    pl.BlockSpec((1, Cout), lambda i, k: (0, 0)),
                ],
                out_specs=pl.BlockSpec((tm, Cout), lambda i, k: (i, 0)),
                scratch_shapes=[pltpu.VMEM((tm, Cout), jnp.float32)],
            ),
            compiler_params=pltpu.CompilerParams(
                dimension_semantics=("parallel", "arbitrary"),
                vmem_limit_bytes=32 * 1024 * 1024,
            ),
        )(x2, wt, b2)

    out = out[:M].reshape(*lead, Cout)
    return out


def init_focal_linear_params(key, in_channels, out_channels, prior_prob=0.01):
    """Match FocalLinear.__init__: normal(std=0.01) weight, bias=-log((1-p)/p)."""
    weight = 0.01 * jax.random.normal(
        key, (out_channels, in_channels), jnp.float32
    )
    bias_value = -math.log((1.0 - prior_prob) / prior_prob)
    bias = jnp.full((out_channels,), bias_value, jnp.float32)
    return weight, bias


if __name__ == "__main__":
    key = jax.random.PRNGKey(0)
    k_x, k_w, k_x2, k_x3, k_w2 = jax.random.split(key, 5)

    # Small focal-head-like shapes: batch=2, seq=8, hidden=32 -> 8 outputs.
    B, S, Cin, Cout = 2, 8, 32, 8
    x = jax.random.normal(k_x, (B, S, Cin), jnp.float32)
    weight, bias = init_focal_linear_params(k_w, Cin, Cout, prior_prob=0.01)

    out = focal_linear(x, weight, bias)
    out = jax.block_until_ready(out)

    ref = jnp.einsum("bsc,oc->bso", x, weight) + bias
    assert out.shape == (B, S, Cout)
    assert jnp.allclose(out, ref, atol=1e-5, rtol=1e-5)

    # Larger case that exercises row tiling + row padding (single-K path).
    x_big = jax.random.normal(k_x2, (4, 200, Cin), jnp.float32)
    out_big = jax.block_until_ready(focal_linear(x_big, weight, bias, tm=256))
    ref_big = jnp.einsum("bsc,oc->bso", x_big, weight) + bias
    assert out_big.shape == (4, 200, Cout)
    assert jnp.allclose(out_big, ref_big, atol=1e-5, rtol=1e-5)

    # Large-Cin case that exercises the K-reduction (accumulator) path.
    Cin2, Cout2 = 640, 16
    x_k = jax.random.normal(k_x3, (2, 96, Cin2), jnp.float32)
    w_k, b_k = init_focal_linear_params(k_w2, Cin2, Cout2, prior_prob=0.01)
    out_k = jax.block_until_ready(focal_linear(x_k, w_k, b_k, tm=128, tk=256))
    ref_k = jnp.einsum("bsc,oc->bso", x_k, w_k) + b_k
    assert out_k.shape == (2, 96, Cout2)
    assert jnp.allclose(out_k, ref_k, atol=1e-4, rtol=1e-5)

    print("KERNEL_OK")
</pallas_src>

<mosaic_0001>
module attributes {stable_mosaic.version = 11 : i64} {
  func.func @_linear_kernel_single_k(%arg0: i32, %arg1: memref<16x32xf32, #tpu.memory_space<vmem>>, %arg2: memref<32x8xf32, #tpu.memory_space<vmem>>, %arg3: memref<1x8xf32, #tpu.memory_space<vmem>>, %arg4: memref<16x8xf32, #tpu.memory_space<vmem>>) attributes {dimension_semantics = [#tpu.dimension_semantics<parallel>], iteration_bounds = array<i64: 1>, scalar_prefetch = 0 : i64, scratch_operands = 0 : i64, tpu.core_type = #tpu.core_type<tc>, window_params = [{transform_indices = @transform_0, window_bounds = array<i64: 16, 32>}, {pipeline_mode = #tpu.pipeline_mode<synchronous>, transform_indices = @transform_1, window_bounds = array<i64: 32, 8>}, {pipeline_mode = #tpu.pipeline_mode<synchronous>, transform_indices = @transform_2, window_bounds = array<i64: 1, 8>}, {transform_indices = @transform_3, window_bounds = array<i64: 16, 8>}]} {
    %c0 = arith.constant 0 : index
    %c0_0 = arith.constant 0 : index
    %0 = vector.load %arg1[%c0, %c0_0] : memref<16x32xf32, #tpu.memory_space<vmem>>, vector<16x32xf32>
    %c0_1 = arith.constant 0 : index
    %c0_2 = arith.constant 0 : index
    %1 = vector.load %arg2[%c0_1, %c0_2] : memref<32x8xf32, #tpu.memory_space<vmem>>, vector<32x8xf32>
    %cst = arith.constant dense<0.000000e+00> : vector<16x8xf32>
    %2 = tpu.matmul %0, %1, %cst {dimension_numbers = #tpu.dot_dimension_numbers<[1], [0], [0], [1], [0, 0, 1, 1], [], []>} : vector<16x32xf32>, vector<32x8xf32>, vector<16x8xf32> -> vector<16x8xf32>
    %c0_3 = arith.constant 0 : index
    %c0_4 = arith.constant 0 : index
    %3 = vector.load %arg3[%c0_3, %c0_4] : memref<1x8xf32, #tpu.memory_space<vmem>>, vector<1x8xf32>
    %4 = vector.broadcast %3 : vector<1x8xf32> to vector<16x8xf32>
    %5 = arith.addf %2, %4 : vector<16x8xf32>
    %c0_5 = arith.constant 0 : index
    %c0_6 = arith.constant 0 : index
    %6 = vector.load %arg4[%c0_5, %c0_6] : memref<16x8xf32, #tpu.memory_space<vmem>>, vector<16x8xf32>
    tpu.vector_store %arg4[%c0_5, %c0_6], %5 {strides = array<i32>} : memref<16x8xf32, #tpu.memory_space<vmem>>, vector<16x8xf32>,
    return
  }
  func.func @transform_0(%arg0: i32) -> (i32, i32) {
    %c0_i32 = arith.constant 0 : i32
    %c0_i32_0 = arith.constant 0 : i32
    return %arg0, %c0_i32 : i32, i32
  }
  func.func @transform_1(%arg0: i32) -> (i32, i32) {
    %c0_i32 = arith.constant 0 : i32
    %c0_i32_0 = arith.constant 0 : i32
    %c0_i32_1 = arith.constant 0 : i32
    return %c0_i32, %c0_i32_0 : i32, i32
  }
  func.func @transform_2(%arg0: i32) -> (i32, i32) {
    %c0_i32 = arith.constant 0 : i32
    %c0_i32_0 = arith.constant 0 : i32
    %c0_i32_1 = arith.constant 0 : i32
    return %c0_i32, %c0_i32_0 : i32, i32
  }
  func.func @transform_3(%arg0: i32) -> (i32, i32) {
    %c0_i32 = arith.constant 0 : i32
    %c0_i32_0 = arith.constant 0 : i32
    return %arg0, %c0_i32 : i32, i32
  }
}

</mosaic_0001>

<bundles_post_ra>
// kernel: tpu_custom_call.1
= control target key start
LH: loop header
LB: loop body
LE: loop exit
PB: predicated region body
PF: predicated region fallthrough
CT: control target
= control target key end

     0   :  { %vm27_vm0 = vcmask 261120   ;;  %vm109_vm1 = vcmask 64512   ;;  %s191_s1 = inlined_call_operand.vmem [shape: f32[32,8], index: 1, kind: input, shape index: {}]   ;;  %s192_s0 = inlined_call_operand.vmem [shape: f32[16,32], index: 0, kind: input, shape index: {}]   ;;  %s193_s2 = inlined_call_operand.vmem [shape: f32[1,8], index: 2, kind: input, shape index: {}]   ;;  %s194_s3 = inlined_call_operand.vmem [shape: f32[16,8], index: 3, kind: output, shape index: {}]  }
   0x1   :  { %v16_v0 = vld [vmem:[%s191_s1] sm:$0xff]  ;;  %v17_v1 = vld [vmem:[%s191_s1 + $0x8] sm:$0xff]  ;;  %v18_v2 = vld [vmem:[%s191_s1 + $0x10] sm:$0xff] }
   0x2   :  { %v136_v3 = vpack.c.bf16 %v17_v1, %v16_v0  ;;  %v19_v4 = vld [vmem:[%s191_s1 + $0x18] sm:$0xff]  ;;  %v14_v5 = vld [vmem:[%s192_s0] sm:$0xff]  ;;  %v15_v7 = vld [vmem:[%s192_s0 + $0x8] sm:$0xff] }
   0x3   :  { %v140_v6 = vpack.c.bf16 %v19_v4, %v18_v2  ;;  %133 = vmatprep.mubr.msk.f32.mxu0 %vm27_vm0, %v14_v5  ;;  %v116_v8 = vld [vmem:[%s193_s2] ss:$0 sm:$0xff] }
   0x4   :  { %137 = vmatprep.subr.bf16.mxu0 %v136_v3 }
   0x5   :  { %139 = vmatpush3.bf16.msra.mxu0 %v136_v3 }
   0x6   :  { %141 = vmatprep.subr.bf16.mxu0 %v140_v6 }
   0x9   :  { %143 = vmatpush3.bf16.msra.mxu0 %v140_v6 }
   0xc   :  { %134 = vmatmul.mubr.msk.f32.vlgmr.msra.gmra.mrb[0].mxu0 %vm27_vm0, %v15_v7 }
  0xdf   :  { %v135_v9 = vpop.f32.mrb[0].mxu0 }
  0xe0   :  { %v106_v10 = vadd.f32 %v135_v9, %v116_v8  ;;  %v100_v11 = vpop.f32.mrb[1].mxu0 }
  0xe1   :  { %v101_v12 = vadd.f32 %v116_v8, %v100_v11 }
  0xe2   :  { %111 = vst.msk [vmem:[%s194_s3 + $0x8] sm:$0xff] %vm109_vm1, %v106_v10 }
  0xe3   :  { %110 = vst.msk [vmem:[%s194_s3] sm:$0xff] %vm109_vm1, %v101_v12 }

</bundles_post_ra>
